<compile_context>
chip_gen: v7x
topology: tpu7x:2x2x1
jax: 0.10.0
libtpu: 0.0.40
codegen_flags: <defaults>
</compile_context>

<pallas_src>
import functools

import jax
import jax.numpy as jnp
from jax.experimental import pallas as pl
from jax.experimental.pallas import tpu as pltpu


def _round_up(n: int, m: int) -> int:
    return ((n + m - 1) // m) * m


# ----------------------------------------------------------------------------
# Kernel: one batch tile through all four layers; intermediates never leave
# VMEM/vregs (single fused kernel => one HBM read of x, one HBM write of out).
# ----------------------------------------------------------------------------
def _mlp_kernel(x_ref,
                w1_ref, b1_ref,
                w2_ref, b2_ref,
                w3_ref, b3_ref,
                w4_ref, b4_ref,
                out_ref):
    cdt = w1_ref.dtype  # compute dtype of the weights (bf16 or f32)

    x = x_ref[...]

    # l1 + ReLU
    h = jnp.dot(x, w1_ref[...], preferred_element_type=jnp.float32) + b1_ref[...]
    h = jnp.maximum(h, 0.0)

    # l2 + ReLU
    h = jnp.dot(h.astype(cdt), w2_ref[...], preferred_element_type=jnp.float32) + b2_ref[...]
    h = jnp.maximum(h, 0.0)

    # l3 (no activation, matches the PyTorch forward)
    h = jnp.dot(h.astype(cdt), w3_ref[...], preferred_element_type=jnp.float32) + b3_ref[...]

    # l4 (logits)
    h = jnp.dot(h.astype(cdt), w4_ref[...], preferred_element_type=jnp.float32) + b4_ref[...]

    out_ref[...] = h.astype(out_ref.dtype)


# ----------------------------------------------------------------------------
# One-time parameter prep (transpose + pad + cast).  Call once, reuse.
# ----------------------------------------------------------------------------
def prepare_params(params, compute_dtype=jnp.bfloat16):
    """params: PyTorch-convention dict (w_i: (out,in), b_i: (out,)).

    Returns a dict of padded (in_pad, out_pad) weights in `compute_dtype` and
    (1, out_pad) f32 biases, with every feature dim rounded up to 128."""
    def prep_w(w):
        out_f, in_f = w.shape
        in_p, out_p = _round_up(in_f, 128), _round_up(out_f, 128)
        wp = jnp.zeros((in_p, out_p), compute_dtype)
        return wp.at[:in_f, :out_f].set(w.T.astype(compute_dtype))

    def prep_b(b):
        out_f = b.shape[0]
        bp = jnp.zeros((1, _round_up(out_f, 128)), jnp.float32)
        return bp.at[0, :out_f].set(b.astype(jnp.float32))

    prepped = {}
    for i in (1, 2, 3, 4):
        prepped[f"w{i}"] = prep_w(params[f"w{i}"])
        prepped[f"b{i}"] = prep_b(params[f"b{i}"])
    return prepped


# ----------------------------------------------------------------------------
# Forward wrapper: pad/cast activations, batch-tiled pallas_call, slice output.
# ----------------------------------------------------------------------------
@functools.partial(jax.jit, static_argnames=("num_classes", "block_batch"))
def neural_net_forward(x, prepped, num_classes, block_batch=256):
    batch, in_f = x.shape
    w1, b1 = prepped["w1"], prepped["b1"]
    w2, b2 = prepped["w2"], prepped["b2"]
    w3, b3 = prepped["w3"], prepped["b3"]
    w4, b4 = prepped["w4"], prepped["b4"]

    in_p, h_p = w1.shape
    c_p = w4.shape[1]
    cdt = w1.dtype
    act_bytes = jnp.dtype(cdt).itemsize

    # Batch tiling: tile size TB (multiple of 8), batch padded to a multiple of TB.
    b8 = _round_up(batch, 8)
    if b8 <= block_batch:
        tb, b_pad = b8, b8
    else:
        tb, b_pad = block_batch, _round_up(batch, block_batch)
    grid = (b_pad // tb,)

    # Per-call activation glue only (weights were prepped once).
    xp = jnp.zeros((b_pad, in_p), cdt).at[:batch, :in_f].set(x.astype(cdt))

    # VMEM budget from actual resident sizes: weights/biases resident once,
    # x/out tiles double-buffered by the pipeline, f32 intermediates in flight.
    # 2x headroom, clamped to [8 MiB, 64 MiB] (64 MiB = v7x per-TC VMEM).
    w_bytes = (in_p * h_p + 2 * h_p * h_p + h_p * c_p) * act_bytes
    bias_bytes = (3 * h_p + c_p) * 4
    tile_bytes = 2 * (tb * in_p * act_bytes + tb * c_p * 4)
    inter_bytes = 3 * tb * h_p * 4
    vmem_limit = int(min(max(2 * (w_bytes + bias_bytes + tile_bytes + inter_bytes),
                             8 << 20), 64 << 20))

    flops = 2 * b_pad * (in_p * h_p + 2 * h_p * h_p + h_p * c_p)
    bytes_accessed = (b_pad * in_p * act_bytes          # x
                      + w_bytes + bias_bytes            # params
                      + b_pad * c_p * 4)                # out

    const = lambda a: pl.BlockSpec(a.shape, lambda i: (0, 0))  # resident across grid

    out = pl.pallas_call(
        _mlp_kernel,
        out_shape=jax.ShapeDtypeStruct((b_pad, c_p), jnp.float32),
        grid=grid,
        in_specs=[pl.BlockSpec((tb, in_p), lambda i: (i, 0)),
                  const(w1), const(b1),
                  const(w2), const(b2),
                  const(w3), const(b3),
                  const(w4), const(b4)],
        out_specs=pl.BlockSpec((tb, c_p), lambda i: (i, 0)),
        compiler_params=pltpu.CompilerParams(
            dimension_semantics=("parallel",),
            vmem_limit_bytes=vmem_limit),
        cost_estimate=pl.CostEstimate(flops=int(flops), transcendentals=0,
                                      bytes_accessed=int(bytes_accessed)),
    )(xp, w1, b1, w2, b2, w3, b3, w4, b4)

    return out[:batch, :num_classes]


# ----------------------------------------------------------------------------
# Deterministic synthetic init (PyTorch Linear shapes) and a pure-JAX reference.
# ----------------------------------------------------------------------------
def init_params(key, input_size, hidden_size, num_classes):
    ks = jax.random.split(key, 8)

    def lin(kw, kb, fan_in, fan_out):
        bound = 1.0 / jnp.sqrt(fan_in)
        w = jax.random.uniform(kw, (fan_out, fan_in), jnp.float32, -bound, bound)
        b = jax.random.uniform(kb, (fan_out,), jnp.float32, -bound, bound)
        return w, b

    w1, b1 = lin(ks[0], ks[1], input_size, hidden_size)
    w2, b2 = lin(ks[2], ks[3], hidden_size, hidden_size)
    w3, b3 = lin(ks[4], ks[5], hidden_size, hidden_size)
    w4, b4 = lin(ks[6], ks[7], hidden_size, num_classes)
    return dict(w1=w1, b1=b1, w2=w2, b2=b2, w3=w3, b3=b3, w4=w4, b4=b4)


def _reference(x, p):
    h = jnp.maximum(x @ p["w1"].T + p["b1"], 0.0)
    h = jnp.maximum(h @ p["w2"].T + p["b2"], 0.0)
    h = h @ p["w3"].T + p["b3"]
    return h @ p["w4"].T + p["b4"]


if __name__ == "__main__":
    key = jax.random.PRNGKey(0)
    k_x, k_p, k_x2, k_p2 = jax.random.split(key, 4)

    # --- case 1: module's demo shapes, f32 compute path (tight check) --------
    batch, input_size, hidden_size, num_classes = 8, 64, 32, 10
    x = jax.random.normal(k_x, (batch, input_size), jnp.float32)
    params = init_params(k_p, input_size, hidden_size, num_classes)

    prepped_f32 = prepare_params(params, compute_dtype=jnp.float32)
    out_f32 = jax.block_until_ready(neural_net_forward(x, prepped_f32, num_classes))
    ref = _reference(x, params)
    assert out_f32.shape == (batch, num_classes)
    assert jnp.allclose(out_f32, ref, atol=1e-4, rtol=1e-4)

    # --- case 1b: same shapes, bf16 weights/activations (MXU fast path) ------
    prepped_bf16 = prepare_params(params, compute_dtype=jnp.bfloat16)
    out_bf16 = jax.block_until_ready(neural_net_forward(x, prepped_bf16, num_classes))
    assert jnp.allclose(out_bf16, ref, atol=5e-2, rtol=5e-2)

    # --- case 2: non-divisible batch + multi-tile grid (exercises pipelining) -
    batch2, input2, hidden2, classes2 = 600, 256, 256, 10
    x2 = jax.random.normal(k_x2, (batch2, input2), jnp.float32)
    params2 = init_params(k_p2, input2, hidden2, classes2)
    prepped2 = prepare_params(params2, compute_dtype=jnp.bfloat16)
    out2 = jax.block_until_ready(
        neural_net_forward(x2, prepped2, classes2, block_batch=256))
    ref2 = _reference(x2, params2)
    assert out2.shape == (batch2, classes2)
    assert jnp.allclose(out2, ref2, atol=5e-2, rtol=5e-2)

    print("KERNEL_OK")
</pallas_src>

<mosaic_0001>
module attributes {stable_mosaic.version = 11 : i64} {
  func.func @_mlp_kernel(%arg0: i32, %arg1: memref<8x128xf32, #tpu.memory_space<vmem>>, %arg2: memref<128x128xf32, #tpu.memory_space<vmem>>, %arg3: memref<1x128xf32, #tpu.memory_space<vmem>>, %arg4: memref<128x128xf32, #tpu.memory_space<vmem>>, %arg5: memref<1x128xf32, #tpu.memory_space<vmem>>, %arg6: memref<128x128xf32, #tpu.memory_space<vmem>>, %arg7: memref<1x128xf32, #tpu.memory_space<vmem>>, %arg8: memref<128x128xf32, #tpu.memory_space<vmem>>, %arg9: memref<1x128xf32, #tpu.memory_space<vmem>>, %arg10: memref<8x128xf32, #tpu.memory_space<vmem>>) attributes {dimension_semantics = [#tpu.dimension_semantics<parallel>], iteration_bounds = array<i64: 1>, scalar_prefetch = 0 : i64, scratch_operands = 0 : i64, tpu.core_type = #tpu.core_type<tc>, window_params = [{transform_indices = @transform_0, window_bounds = array<i64: 8, 128>}, {pipeline_mode = #tpu.pipeline_mode<synchronous>, transform_indices = @transform_1, window_bounds = array<i64: 128, 128>}, {pipeline_mode = #tpu.pipeline_mode<synchronous>, transform_indices = @transform_2, window_bounds = array<i64: 1, 128>}, {pipeline_mode = #tpu.pipeline_mode<synchronous>, transform_indices = @transform_3, window_bounds = array<i64: 128, 128>}, {pipeline_mode = #tpu.pipeline_mode<synchronous>, transform_indices = @transform_4, window_bounds = array<i64: 1, 128>}, {pipeline_mode = #tpu.pipeline_mode<synchronous>, transform_indices = @transform_5, window_bounds = array<i64: 128, 128>}, {pipeline_mode = #tpu.pipeline_mode<synchronous>, transform_indices = @transform_6, window_bounds = array<i64: 1, 128>}, {pipeline_mode = #tpu.pipeline_mode<synchronous>, transform_indices = @transform_7, window_bounds = array<i64: 128, 128>}, {pipeline_mode = #tpu.pipeline_mode<synchronous>, transform_indices = @transform_8, window_bounds = array<i64: 1, 128>}, {transform_indices = @transform_9, window_bounds = array<i64: 8, 128>}]} {
    %c0 = arith.constant 0 : index
    %c0_0 = arith.constant 0 : index
    %0 = vector.load %arg1[%c0, %c0_0] : memref<8x128xf32, #tpu.memory_space<vmem>>, vector<8x128xf32>
    %c0_1 = arith.constant 0 : index
    %c0_2 = arith.constant 0 : index
    %1 = vector.load %arg2[%c0_1, %c0_2] : memref<128x128xf32, #tpu.memory_space<vmem>>, vector<128x128xf32>
    %cst = arith.constant dense<0.000000e+00> : vector<8x128xf32>
    %2 = tpu.matmul %0, %1, %cst {dimension_numbers = #tpu.dot_dimension_numbers<[1], [0], [0], [1], [0, 0, 1, 1], [], []>} : vector<8x128xf32>, vector<128x128xf32>, vector<8x128xf32> -> vector<8x128xf32>
    %c0_3 = arith.constant 0 : index
    %c0_4 = arith.constant 0 : index
    %3 = vector.load %arg3[%c0_3, %c0_4] : memref<1x128xf32, #tpu.memory_space<vmem>>, vector<1x128xf32>
    %4 = vector.broadcast %3 : vector<1x128xf32> to vector<8x128xf32>
    %5 = arith.addf %2, %4 : vector<8x128xf32>
    %cst_5 = arith.constant 0.000000e+00 : f32
    %6 = vector.broadcast %cst_5 : f32 to vector<8x128xf32>
    %7 = arith.maximumf %5, %6 : vector<8x128xf32>
    %c0_6 = arith.constant 0 : index
    %c0_7 = arith.constant 0 : index
    %8 = vector.load %arg4[%c0_6, %c0_7] : memref<128x128xf32, #tpu.memory_space<vmem>>, vector<128x128xf32>
    %cst_8 = arith.constant dense<0.000000e+00> : vector<8x128xf32>
    %9 = tpu.matmul %7, %8, %cst_8 {dimension_numbers = #tpu.dot_dimension_numbers<[1], [0], [0], [1], [0, 0, 1, 1], [], []>} : vector<8x128xf32>, vector<128x128xf32>, vector<8x128xf32> -> vector<8x128xf32>
    %c0_9 = arith.constant 0 : index
    %c0_10 = arith.constant 0 : index
    %10 = vector.load %arg5[%c0_9, %c0_10] : memref<1x128xf32, #tpu.memory_space<vmem>>, vector<1x128xf32>
    %11 = vector.broadcast %10 : vector<1x128xf32> to vector<8x128xf32>
    %12 = arith.addf %9, %11 : vector<8x128xf32>
    %cst_11 = arith.constant 0.000000e+00 : f32
    %13 = vector.broadcast %cst_11 : f32 to vector<8x128xf32>
    %14 = arith.maximumf %12, %13 : vector<8x128xf32>
    %c0_12 = arith.constant 0 : index
    %c0_13 = arith.constant 0 : index
    %15 = vector.load %arg6[%c0_12, %c0_13] : memref<128x128xf32, #tpu.memory_space<vmem>>, vector<128x128xf32>
    %cst_14 = arith.constant dense<0.000000e+00> : vector<8x128xf32>
    %16 = tpu.matmul %14, %15, %cst_14 {dimension_numbers = #tpu.dot_dimension_numbers<[1], [0], [0], [1], [0, 0, 1, 1], [], []>} : vector<8x128xf32>, vector<128x128xf32>, vector<8x128xf32> -> vector<8x128xf32>
    %c0_15 = arith.constant 0 : index
    %c0_16 = arith.constant 0 : index
    %17 = vector.load %arg7[%c0_15, %c0_16] : memref<1x128xf32, #tpu.memory_space<vmem>>, vector<1x128xf32>
    %18 = vector.broadcast %17 : vector<1x128xf32> to vector<8x128xf32>
    %19 = arith.addf %16, %18 : vector<8x128xf32>
    %c0_17 = arith.constant 0 : index
    %c0_18 = arith.constant 0 : index
    %20 = vector.load %arg8[%c0_17, %c0_18] : memref<128x128xf32, #tpu.memory_space<vmem>>, vector<128x128xf32>
    %cst_19 = arith.constant dense<0.000000e+00> : vector<8x128xf32>
    %21 = tpu.matmul %19, %20, %cst_19 {dimension_numbers = #tpu.dot_dimension_numbers<[1], [0], [0], [1], [0, 0, 1, 1], [], []>} : vector<8x128xf32>, vector<128x128xf32>, vector<8x128xf32> -> vector<8x128xf32>
    %c0_20 = arith.constant 0 : index
    %c0_21 = arith.constant 0 : index
    %22 = vector.load %arg9[%c0_20, %c0_21] : memref<1x128xf32, #tpu.memory_space<vmem>>, vector<1x128xf32>
    %23 = vector.broadcast %22 : vector<1x128xf32> to vector<8x128xf32>
    %24 = arith.addf %21, %23 : vector<8x128xf32>
    %c0_22 = arith.constant 0 : index
    %c0_23 = arith.constant 0 : index
    %25 = vector.load %arg10[%c0_22, %c0_23] : memref<8x128xf32, #tpu.memory_space<vmem>>, vector<8x128xf32>
    tpu.vector_store %arg10[%c0_22, %c0_23], %24 {strides = array<i32>} : memref<8x128xf32, #tpu.memory_space<vmem>>, vector<8x128xf32>,
    return
  }
  func.func @transform_0(%arg0: i32) -> (i32, i32) {
    %c0_i32 = arith.constant 0 : i32
    %c0_i32_0 = arith.constant 0 : i32
    return %arg0, %c0_i32 : i32, i32
  }
  func.func @transform_1(%arg0: i32) -> (i32, i32) {
    %c0_i32 = arith.constant 0 : i32
    %c0_i32_0 = arith.constant 0 : i32
    %c0_i32_1 = arith.constant 0 : i32
    return %c0_i32, %c0_i32_0 : i32, i32
  }
  func.func @transform_2(%arg0: i32) -> (i32, i32) {
    %c0_i32 = arith.constant 0 : i32
    %c0_i32_0 = arith.constant 0 : i32
    %c0_i32_1 = arith.constant 0 : i32
    return %c0_i32, %c0_i32_0 : i32, i32
  }
  func.func @transform_3(%arg0: i32) -> (i32, i32) {
    %c0_i32 = arith.constant 0 : i32
    %c0_i32_0 = arith.constant 0 : i32
    %c0_i32_1 = arith.constant 0 : i32
    return %c0_i32, %c0_i32_0 : i32, i32
  }
  func.func @transform_4(%arg0: i32) -> (i32, i32) {
    %c0_i32 = arith.constant 0 : i32
    %c0_i32_0 = arith.constant 0 : i32
    %c0_i32_1 = arith.constant 0 : i32
    return %c0_i32, %c0_i32_0 : i32, i32
  }
  func.func @transform_5(%arg0: i32) -> (i32, i32) {
    %c0_i32 = arith.constant 0 : i32
    %c0_i32_0 = arith.constant 0 : i32
    %c0_i32_1 = arith.constant 0 : i32
    return %c0_i32, %c0_i32_0 : i32, i32
  }
  func.func @transform_6(%arg0: i32) -> (i32, i32) {
    %c0_i32 = arith.constant 0 : i32
    %c0_i32_0 = arith.constant 0 : i32
    %c0_i32_1 = arith.constant 0 : i32
    return %c0_i32, %c0_i32_0 : i32, i32
  }
  func.func @transform_7(%arg0: i32) -> (i32, i32) {
    %c0_i32 = arith.constant 0 : i32
    %c0_i32_0 = arith.constant 0 : i32
    %c0_i32_1 = arith.constant 0 : i32
    return %c0_i32, %c0_i32_0 : i32, i32
  }
  func.func @transform_8(%arg0: i32) -> (i32, i32) {
    %c0_i32 = arith.constant 0 : i32
    %c0_i32_0 = arith.constant 0 : i32
    %c0_i32_1 = arith.constant 0 : i32
    return %c0_i32, %c0_i32_0 : i32, i32
  }
  func.func @transform_9(%arg0: i32) -> (i32, i32) {
    %c0_i32 = arith.constant 0 : i32
    %c0_i32_0 = arith.constant 0 : i32
    return %arg0, %c0_i32 : i32, i32
  }
}

</mosaic_0001>

<bundles_post_ra>
// kernel: neural_net_forward.1
= control target key start
LH: loop header
LB: loop body
LE: loop exit
PB: predicated region body
PF: predicated region fallthrough
CT: control target
= control target key end

     0   :  { %14 = vsyncpa [#allocation3], 0  ;;  %s1118_s0 = inlined_call_operand.vmem [shape: f32[8,128], index: 0, kind: input, shape index: {}]   ;;  %s1119_s1 = inlined_call_operand.hbm [shape: f32[128,128], index: 1, kind: input, shape index: {}]   ;;  %s1120_s2 = inlined_call_operand.vmem [shape: f32[1,128], index: 2, kind: input, shape index: {}]   ;;  %s1121_s3 = inlined_call_operand.hbm [shape: f32[128,128], index: 3, kind: input, shape index: {}]   ;;  %s1122_s4 = inlined_call_operand.vmem [shape: f32[1,128], index: 4, kind: input, shape index: {}]   ;;  %s1123_s5 = inlined_call_operand.hbm [shape: f32[128,128], index: 5, kind: input, shape index: {}]   ;;  %s1124_s6 = inlined_call_operand.vmem [shape: f32[1,128], index: 6, kind: input, shape index: {}]   ;;  %s1125_s7 = inlined_call_operand.hbm [shape: f32[128,128], index: 7, kind: input, shape index: {}]   ;;  %s1126_s8 = inlined_call_operand.vmem [shape: f32[1,128], index: 8, kind: input, shape index: {}]   ;;  %s1127_s9 = inlined_call_operand.hbm [shape: f32[8,128], index: 9, kind: output, shape index: {}]  }
   0x1   :  { %15 = vsyncpa [#allocation6], 0 }
   0x2   :  { %16 = vsyncpa [#allocation9], 0 }
   0x3   :  { %17 = vsyncpa [#allocation4], 0  ;;  %s917_s30 = smov [#allocation5]   ;;  %s918_s11 = smov [#allocation2]  }
   0x4   :  { %s39_s10 = sshll.u32 %s917_s30, 4  ;;  %s25_s12 = sshll.u32 %s918_s11, 4  ;;  %s40_s10 = int_to_ptr.vmem [resolvable:$true] %s39_s10  ;;  %s977_s12 = int_to_ptr.vmem [resolvable:$true] %s25_s12 }
   0x5   :  { %s799_s15 = scalar_lea.hbm %s1121_s3, 2048 }
   0x6   :  { %p800_p0 = scmp.ne.s32.totalorder %s1121_s3, %s799_s15  ;;  %p803_p1 = scmp.lt.u32.totalorder %s799_s15, %s1121_s3 }
   0x8   :  { %p805_p2 = pnand %p803_p1, %p800_p0 }
   0xa   :  { %808 = shalt.err (!%p805_p2)
}
   0xb   :  { %s809_s20 = scalar_lea.vmem %s40_s10, 2048  ;;  %p814_p4 = scmp.lt.s32.totalorder %s40_s10, %s40_s10 }
   0xc   :  { %p810_p3 = scmp.ne.s32.totalorder %s40_s10, %s809_s20  ;;  %p815_p5 = scmp.lt.s32.totalorder %s809_s20, %s809_s20 }
   0xe   :  { %p816_p6 = por %p815_p5, %p814_p4 }
  0x10   :  { %p817_p7 = pnand %p816_p6, %p810_p3 }
  0x12   :  { %820 = shalt.err (!%p817_p7)
}
  0x13   :  { %s919_s21 = smov 128   ;;  %s920_s22 = smov 8  }
  0x14   :  { %45 = dma.hbm_to_vmem [thread:$0]  %s1121_s3, 2048, %s40_s10, [#allocation6], %s919_s21, %s919_s21, %s920_s22  }
  0x15   :  { %s821_s27 = scalar_lea.hbm %s1119_s1, 2048 }
  0x16   :  { %p822_p8 = scmp.ne.s32.totalorder %s1119_s1, %s821_s27  ;;  %p825_p9 = scmp.lt.u32.totalorder %s821_s27, %s1119_s1 }
  0x18   :  { %p827_p10 = pnand %p825_p9, %p822_p8 }
  0x1a   :  { %830 = shalt.err (!%p827_p10)
}
  0x1b   :  { %s831_s13 = scalar_lea.vmem %s977_s12, 2048  ;;  %p836_p12 = scmp.lt.s32.totalorder %s977_s12, %s977_s12 }
  0x1c   :  { %p832_p11 = scmp.ne.s32.totalorder %s977_s12, %s831_s13  ;;  %p837_p13 = scmp.lt.s32.totalorder %s831_s13, %s831_s13 }
  0x1e   :  { %p838_p0 = por %p837_p13, %p836_p12 }
  0x20   :  { %p839_p1 = pnand %p838_p0, %p832_p11 }
  0x22   :  { %842 = shalt.err (!%p839_p1)
}
  0x23   :  { %31 = dma.hbm_to_vmem [thread:$0]  %s1119_s1, 2048, %s977_s12, [#allocation3], %s919_s21, %s919_s21, %s920_s22  }
  0x24   :  { %s921_s14 = smov [#allocation7]   ;;  %s922_s16 = smov [#allocation8]  }
  0x25   :  { %s53_s15 = sshll.u32 %s921_s14, 4  ;;  %s67_s17 = sshll.u32 %s922_s16, 4  ;;  %s54_s15 = int_to_ptr.vmem [resolvable:$true] %s53_s15  ;;  %s1014_s17 = int_to_ptr.vmem [resolvable:$true] %s67_s17 }
  0x26   :  { %s843_s20 = scalar_lea.hbm %s1123_s5, 2048 }
  0x27   :  { %p844_p2 = scmp.ne.s32.totalorder %s1123_s5, %s843_s20  ;;  %p847_p3 = scmp.lt.u32.totalorder %s843_s20, %s1123_s5 }
  0x29   :  { %p849_p4 = pnand %p847_p3, %p844_p2 }
  0x2b   :  { %852 = shalt.err (!%p849_p4)
}
  0x2c   :  { %s853_s1 = scalar_lea.vmem %s54_s15, 2048  ;;  %p858_p6 = scmp.lt.s32.totalorder %s54_s15, %s54_s15 }
  0x2d   :  { %p854_p5 = scmp.ne.s32.totalorder %s54_s15, %s853_s1  ;;  %p859_p7 = scmp.lt.s32.totalorder %s853_s1, %s853_s1 }
  0x2f   :  { %p860_p8 = por %p859_p7, %p858_p6 }
  0x31   :  { %p861_p9 = pnand %p860_p8, %p854_p5 }
  0x33   :  { %864 = shalt.err (!%p861_p9)
}
  0x34   :  { %59 = dma.hbm_to_vmem [thread:$0]  %s1123_s5, 2048, %s54_s15, [#allocation6], %s919_s21, %s919_s21, %s920_s22  }
  0x35   :  { %s865_s30 = scalar_lea.hbm %s1125_s7, 2048 }
  0x36   :  { %p866_p10 = scmp.ne.s32.totalorder %s1125_s7, %s865_s30  ;;  %p869_p11 = scmp.lt.u32.totalorder %s865_s30, %s1125_s7 }
  0x38   :  { %p871_p12 = pnand %p869_p11, %p866_p10 }
  0x3a   :  { %874 = shalt.err (!%p871_p12)
}
  0x3b   :  { %s875_s14 = scalar_lea.vmem %s1014_s17, 2048  ;;  %p880_p0 = scmp.lt.s32.totalorder %s1014_s17, %s1014_s17 }
  0x3c   :  { %p876_p13 = scmp.ne.s32.totalorder %s1014_s17, %s875_s14  ;;  %p881_p1 = scmp.lt.s32.totalorder %s875_s14, %s875_s14 }
  0x3e   :  { %p882_p2 = por %p881_p1, %p880_p0 }
  0x40   :  { %p883_p3 = pnand %p882_p2, %p876_p13 }
  0x42   :  { %886 = shalt.err (!%p883_p3)
}
  0x43   :  { %73 = dma.hbm_to_vmem [thread:$0]  %s1125_s7, 2048, %s1014_s17, [#allocation9], %s919_s21, %s919_s21, %s920_s22  }
  0x44   :  { %909 = dma.done.wait [#allocation3], 2048  }
  0x45   :  { %910 = vsyncadd [#allocation3], 4294965248 }
  0x46   :  { %911 = dma.done.wait [#allocation6], 4096  }
  0x47   :  { %912 = vsyncadd [#allocation6], 4294963200 }
  0x48   :  { %913 = dma.done.wait [#allocation9], 2048  }
  0x49   :  { %914 = vsyncadd [#allocation9], 4294965248  ;;  %v923_v0 = vmov 0.0|0.0   ;;  %vm924_vm0 = vmmov 0   ;;  %v925_v1 = vmov 0.0   ;;  %v89_v2 = vld [vmem:[#allocation2] sm:$0xff] }
  0x4a   :  { %693 = vmatprep.subr.bf16.mxu0 %v923_v0  ;;  %585 = vmatprep.mubr.msk.f32.mxu0 %vm924_vm0, %v925_v1  ;;  %v90_v3 = vld [vmem:[#allocation2 + $0x8] sm:$0xff]  ;;  %v91_v4 = vld [vmem:[#allocation2 + $0x10] sm:$0xff]  ;;  %v92_v6 = vld [vmem:[#allocation2 + $0x18] sm:$0xff] }
  0x4b   :  { %717 = vmatprep.subr.bf16.mxu1 %v923_v0  ;;  %620 = vmatprep.mubr.msk.f32.mxu1 %vm924_vm0, %v925_v1  ;;  %v694_v5 = vpack.c.bf16 %v90_v3, %v89_v2  ;;  %v697_v7 = vpack.c.bf16 %v92_v6, %v91_v4  ;;  %v93_v8 = vld [vmem:[#allocation2 + $0x20] sm:$0xff]  ;;  %v94_v9 = vld [vmem:[#allocation2 + $0x28] sm:$0xff]  ;;  %v185_v12 = vld [vmem:[#allocation5 + $0x10] sm:$0xff] }
  0x4c   :  { %v183_v10 = vld [vmem:[#allocation5] sm:$0xff]  ;;  %v184_v11 = vld [vmem:[#allocation5 + $0x8] sm:$0xff]  ;;  %v186_v13 = vld [vmem:[#allocation5 + $0x18] sm:$0xff]  ;;  %v700_v14 = vpack.c.bf16 %v94_v9, %v93_v8 }
  0x4d   :  { %695 = vmatpush3.bf16.msra.mxu0 %v694_v5  ;;  %v718_v15 = vpack.c.bf16 %v184_v11, %v183_v10  ;;  %v95_v16 = vld [vmem:[#allocation2 + $0x30] sm:$0xff]  ;;  %v96_v17 = vld [vmem:[#allocation2 + $0x38] sm:$0xff]  ;;  %v721_v18 = vpack.c.bf16 %v186_v13, %v185_v12  ;;  %v187_v19 = vld [vmem:[#allocation5 + $0x20] sm:$0xff] }
  0x4e   :  { %696 = vmatprep.subr.bf16.mxu0 %v923_v0  ;;  %v188_v20 = vld [vmem:[#allocation5 + $0x28] sm:$0xff]  ;;  %v703_v21 = vpack.c.bf16 %v96_v17, %v95_v16  ;;  %v97_v22 = vld [vmem:[#allocation2 + $0x40] sm:$0xff]  ;;  %v189_v25 = vld [vmem:[#allocation5 + $0x30] sm:$0xff] }
  0x4f   :  { %719 = vmatpush3.bf16.msra.mxu1 %v718_v15  ;;  %v98_v23 = vld [vmem:[#allocation2 + $0x48] sm:$0xff]  ;;  %v724_v24 = vpack.c.bf16 %v188_v20, %v187_v19  ;;  %v190_v26 = vld [vmem:[#allocation5 + $0x38] sm:$0xff]  ;;  %v99_v28 = vld [vmem:[#allocation2 + $0x50] sm:$0xff] }
  0x50   :  { %720 = vmatprep.subr.bf16.mxu1 %v923_v0  ;;  %v706_v27 = vpack.c.bf16 %v98_v23, %v97_v22  ;;  %v100_v29 = vld [vmem:[#allocation2 + $0x58] sm:$0xff]  ;;  %v727_v30 = vpack.c.bf16 %v190_v26, %v189_v25  ;;  %v191_v31 = vld [vmem:[#allocation5 + $0x40] sm:$0xff]  ;;  %v192_v32 = vld [vmem:[#allocation5 + $0x48] sm:$0xff] }
  0x51   :  { %698 = vmatpush3.bf16.msra.mxu0 %v697_v7  ;;  %v709_v33 = vpack.c.bf16 %v100_v29, %v99_v28  ;;  %v101_v34 = vld [vmem:[#allocation2 + $0x60] sm:$0xff]  ;;  %v102_v35 = vld [vmem:[#allocation2 + $0x68] sm:$0xff]  ;;  %v730_v36 = vpack.c.bf16 %v192_v32, %v191_v31  ;;  %v193_v37 = vld [vmem:[#allocation5 + $0x50] sm:$0xff] }
  0x52   :  { %699 = vmatprep.subr.bf16.mxu0 %v923_v0  ;;  %v194_v38 = vld [vmem:[#allocation5 + $0x58] sm:$0xff]  ;;  %v712_v39 = vpack.c.bf16 %v102_v35, %v101_v34  ;;  %v103_v40 = vld [vmem:[#allocation2 + $0x70] sm:$0xff]  ;;  %v195_v43 = vld [vmem:[#allocation5 + $0x60] sm:$0xff] }
  0x53   :  { %722 = vmatpush3.bf16.msra.mxu1 %v721_v18  ;;  %v104_v41 = vld [vmem:[#allocation2 + $0x78] sm:$0xff]  ;;  %v733_v42 = vpack.c.bf16 %v194_v38, %v193_v37  ;;  %v196_v44 = vld [vmem:[#allocation5 + $0x68] sm:$0xff]  ;;  %v88_v47 = vld [vmem:[%s1118_s0] sm:$0xff] }
  0x54   :  { %723 = vmatprep.subr.bf16.mxu1 %v923_v0  ;;  %v715_v45 = vpack.c.bf16 %v104_v41, %v103_v40  ;;  %v736_v46 = vpack.c.bf16 %v196_v44, %v195_v43  ;;  %v197_v48 = vld [vmem:[#allocation5 + $0x70] sm:$0xff]  ;;  %v198_v49 = vld [vmem:[#allocation5 + $0x78] sm:$0xff]  ;;  %v277_v51 = vld [vmem:[#allocation7] sm:$0xff] }
  0x55   :  { %701 = vmatpush3.bf16.msra.mxu0 %v700_v14  ;;  %v739_v50 = vpack.c.bf16 %v198_v49, %v197_v48  ;;  %v278_v52 = vld [vmem:[#allocation7 + $0x8] sm:$0xff]  ;;  %v279_v53 = vld [vmem:[#allocation7 + $0x10] sm:$0xff]  ;;  %v280_v55 = vld [vmem:[#allocation7 + $0x18] sm:$0xff] }
  0x56   :  { %702 = vmatprep.subr.bf16.mxu0 %v923_v0  ;;  %v742_v54 = vpack.c.bf16 %v278_v52, %v277_v51  ;;  %v745_v56 = vpack.c.bf16 %v280_v55, %v279_v53  ;;  %v281_v57 = vld [vmem:[#allocation7 + $0x20] sm:$0xff]  ;;  %v282_v58 = vld [vmem:[#allocation7 + $0x28] sm:$0xff]  ;;  %v283_v60 = vld [vmem:[#allocation7 + $0x30] sm:$0xff] }
  0x57   :  { %725 = vmatpush3.bf16.msra.mxu1 %v724_v24  ;;  %v748_v59 = vpack.c.bf16 %v282_v58, %v281_v57  ;;  %v284_v61 = vld [vmem:[#allocation7 + $0x38] sm:$0xff]  ;;  %v285_v63 = vld [vmem:[#allocation7 + $0x40] sm:$0xff]  ;;  %v286_v2 = vld [vmem:[#allocation7 + $0x48] sm:$0xff] }
  0x58   :  { %726 = vmatprep.subr.bf16.mxu1 %v923_v0  ;;  %v751_v62 = vpack.c.bf16 %v284_v61, %v283_v60  ;;  %v754_v3 = vpack.c.bf16 %v286_v2, %v285_v63  ;;  %v287_v4 = vld [vmem:[#allocation7 + $0x50] sm:$0xff]  ;;  %v288_v5 = vld [vmem:[#allocation7 + $0x58] sm:$0xff]  ;;  %v289_v7 = vld [vmem:[#allocation7 + $0x60] sm:$0xff] }
  0x59   :  { %704 = vmatpush3.bf16.msra.mxu0 %v703_v21  ;;  %v757_v6 = vpack.c.bf16 %v288_v5, %v287_v4  ;;  %v290_v8 = vld [vmem:[#allocation7 + $0x68] sm:$0xff]  ;;  %v481_v10 = vld [vmem:[%s1120_s2] ss:$0 sm:$0xff]  ;;  %v291_v15 = vld [vmem:[#allocation7 + $0x70] sm:$0xff] }
  0x5a   :  { %705 = vmatprep.subr.bf16.mxu0 %v923_v0  ;;  %v760_v9 = vpack.c.bf16 %v290_v8, %v289_v7  ;;  %v292_v16 = vld [vmem:[#allocation7 + $0x78] sm:$0xff]  ;;  %v370_v18 = vld [vmem:[#allocation8] sm:$0xff]  ;;  %v371_v19 = vld [vmem:[#allocation8 + $0x8] sm:$0xff] }
  0x5b   :  { %728 = vmatpush3.bf16.msra.mxu1 %v727_v30  ;;  %v763_v17 = vpack.c.bf16 %v292_v16, %v291_v15  ;;  %v372_v20 = vld [vmem:[#allocation8 + $0x10] sm:$0xff]  ;;  %v766_v21 = vpack.c.bf16 %v371_v19, %v370_v18  ;;  %v373_v22 = vld [vmem:[#allocation8 + $0x18] sm:$0xff]  ;;  %v374_v24 = vld [vmem:[#allocation8 + $0x20] sm:$0xff] }
  0x5c   :  { %729 = vmatprep.subr.bf16.mxu1 %v923_v0  ;;  %v769_v23 = vpack.c.bf16 %v373_v22, %v372_v20  ;;  %v375_v25 = vld [vmem:[#allocation8 + $0x28] sm:$0xff]  ;;  %v378_v29 = vld [vmem:[#allocation8 + $0x40] sm:$0xff]  ;;  %v380_v32 = vld [vmem:[#allocation8 + $0x50] sm:$0xff] }
  0x5d   :  { %707 = vmatpush3.bf16.msra.mxu0 %v706_v27  ;;  %v772_v26 = vpack.c.bf16 %v375_v25, %v374_v24  ;;  %v377_v27 = vld [vmem:[#allocation8 + $0x38] sm:$0xff]  ;;  %v379_v30 = vld [vmem:[#allocation8 + $0x48] sm:$0xff]  ;;  %v382_v35 = vld [vmem:[#allocation8 + $0x60] sm:$0xff] }
  0x5e   :  { %708 = vmatprep.subr.bf16.mxu0 %v923_v0  ;;  %v778_v31 = vpack.c.bf16 %v379_v30, %v378_v29  ;;  %v482_v38 = vld [vmem:[%s1122_s4] ss:$0 sm:$0xff]  ;;  %v384_v43 = vld [vmem:[#allocation8 + $0x70] sm:$0xff]  ;;  %v385_v44 = vld [vmem:[#allocation8 + $0x78] sm:$0xff]  ;;  %s926_s4 = smov [#allocation10]  }
  0x5f   :  { %731 = vmatpush3.bf16.msra.mxu1 %v730_v36  ;;  %v383_v36 = vld [vmem:[#allocation8 + $0x68] sm:$0xff]  ;;  %v484_v49 = vld [vmem:[%s1126_s8] ss:$0 sm:$0xff]  ;;  %s470_s23 = sshll.u32 %s926_s4, 4  ;;  %s471_s23 = int_to_ptr.vmem [resolvable:$true] %s470_s23 }
  0x60   :  { %732 = vmatprep.subr.bf16.mxu1 %v923_v0  ;;  %v784_v37 = vpack.c.bf16 %v383_v36, %v382_v35  ;;  %s887_s24 = scalar_lea.vmem %s471_s23, 128  ;;  %p892_p5 = scmp.lt.s32.totalorder %s471_s23, %s471_s23 }
  0x61   :  { %710 = vmatpush3.bf16.msra.mxu0 %v709_v33  ;;  %v381_v33 = vld [vmem:[#allocation8 + $0x58] sm:$0xff]  ;;  %p888_p4 = scmp.ne.s32.totalorder %s471_s23, %s887_s24  ;;  %p893_p6 = scmp.lt.s32.totalorder %s887_s24, %s887_s24 }
  0x62   :  { %711 = vmatprep.subr.bf16.mxu0 %v923_v0  ;;  %v781_v34 = vpack.c.bf16 %v381_v33, %v380_v32 }
  0x63   :  { %734 = vmatpush3.bf16.msra.mxu1 %v733_v42  ;;  %p894_p7 = por %p893_p6, %p892_p5 }
  0x64   :  { %735 = vmatprep.subr.bf16.mxu1 %v923_v0 }
  0x65   :  { %713 = vmatpush3.bf16.msra.mxu0 %v712_v39  ;;  %p895_p8 = pnand %p894_p7, %p888_p4 }
  0x66   :  { %714 = vmatprep.subr.bf16.mxu0 %v923_v0 }
  0x67   :  { %737 = vmatpush3.bf16.msra.mxu1 %v736_v46  ;;  %v483_v46 = vld [vmem:[%s1124_s6] ss:$0 sm:$0xff] }
  0x68   :  { %738 = vmatprep.subr.bf16.mxu1 %v923_v0 }
  0x69   :  { %716 = vmatpush3.bf16.msra.mxu0 %v715_v45  ;;  %v787_v45 = vpack.c.bf16 %v385_v44, %v384_v43 }
  0x6a   :  { %741 = vmatprep.subr.bf16.mxu0 %v923_v0 }
  0x6b   :  { %740 = vmatpush3.bf16.msra.mxu1 %v739_v50 }
  0x6c   :  { %586 = vmatmul.mubr.f32.vlgmr.msra.gmra.mrb[0].mxu0 %v88_v47  ;;  %765 = vmatprep.subr.bf16.mxu1 %v923_v0 }
  0x6d   :  { %655 = vmatprep.mubr.msk.f32.mxu0 %vm924_vm0, %v925_v1  ;;  %743 = vmatpush3.bf16.msra.mxu0 %v742_v54 }
  0x6e   :  { %744 = vmatprep.subr.bf16.mxu0 %v923_v0 }
  0x71   :  { %746 = vmatpush3.bf16.msra.mxu0 %v745_v56 }
  0x72   :  { %747 = vmatprep.subr.bf16.mxu0 %v923_v0 }
  0x75   :  { %749 = vmatpush3.bf16.msra.mxu0 %v748_v59 }
  0x76   :  { %750 = vmatprep.subr.bf16.mxu0 %v923_v0 }
  0x79   :  { %752 = vmatpush3.bf16.msra.mxu0 %v751_v62 }
  0x7a   :  { %753 = vmatprep.subr.bf16.mxu0 %v923_v0 }
  0x7d   :  { %755 = vmatpush3.bf16.msra.mxu0 %v754_v3 }
  0x7e   :  { %756 = vmatprep.subr.bf16.mxu0 %v923_v0 }
  0x81   :  { %758 = vmatpush3.bf16.msra.mxu0 %v757_v6 }
  0x82   :  { %759 = vmatprep.subr.bf16.mxu0 %v923_v0 }
  0x85   :  { %761 = vmatpush3.bf16.msra.mxu0 %v760_v9 }
  0x86   :  { %762 = vmatprep.subr.bf16.mxu0 %v923_v0 }
  0x89   :  { %764 = vmatpush3.bf16.msra.mxu0 %v763_v17 }
 0x13f   :  { %v178_v11 = vpop.f32.mrb[0].mxu0 }
 0x140   :  { %v179_v12 = vadd.f32 %v481_v10, %v178_v11  ;;  %v587_v13 = vpop.f32.mrb[1].mxu0 }
 0x142   :  { %v182_v14 = vmax.f32 %v179_v12, 0.0 }
 0x144   :  { %621 = vmatmul.mubr.f32.vlgmr.msra.gmra.mrb[0].mxu1 %v182_v14 }
 0x145   :  { %690 = vmatprep.mubr.msk.f32.mxu1 %vm924_vm0, %v925_v1  ;;  %767 = vmatpush3.bf16.msra.mxu1 %v766_v21  ;;  %v376_v1 = vld [vmem:[#allocation8 + $0x30] sm:$0xff] }
 0x146   :  { %768 = vmatprep.subr.bf16.mxu1 %v923_v0  ;;  %v775_v28 = vpack.c.bf16 %v377_v27, %v376_v1 }
 0x149   :  { %770 = vmatpush3.bf16.msra.mxu1 %v769_v23 }
 0x14a   :  { %771 = vmatprep.subr.bf16.mxu1 %v923_v0 }
 0x14d   :  { %773 = vmatpush3.bf16.msra.mxu1 %v772_v26 }
 0x14e   :  { %774 = vmatprep.subr.bf16.mxu1 %v923_v0 }
 0x151   :  { %776 = vmatpush3.bf16.msra.mxu1 %v775_v28 }
 0x152   :  { %777 = vmatprep.subr.bf16.mxu1 %v923_v0 }
 0x155   :  { %779 = vmatpush3.bf16.msra.mxu1 %v778_v31 }
 0x156   :  { %780 = vmatprep.subr.bf16.mxu1 %v923_v0 }
 0x159   :  { %782 = vmatpush3.bf16.msra.mxu1 %v781_v34 }
 0x15a   :  { %783 = vmatprep.subr.bf16.mxu1 %v923_v0 }
 0x15d   :  { %785 = vmatpush3.bf16.msra.mxu1 %v784_v37 }
 0x15e   :  { %786 = vmatprep.subr.bf16.mxu1 %v923_v0 }
 0x161   :  { %788 = vmatpush3.bf16.msra.mxu1 %v787_v45 }
 0x217   :  { %v272_v39 = vpop.f32.mrb[0].mxu1 }
 0x218   :  { %v273_v40 = vadd.f32 %v482_v38, %v272_v39  ;;  %v622_v41 = vpop.f32.mrb[1].mxu1 }
 0x21a   :  { %v276_v42 = vmax.f32 %v273_v40, 0.0 }
 0x21c   :  { %656 = vmatmul.mubr.f32.vlgmr.msra.gmra.mrb[2].mxu0 %v276_v42 }
 0x2ef   :  { %v366_v47 = vpop.f32.mrb[2].mxu0 }
 0x2f0   :  { %v367_v48 = vadd.f32 %v483_v46, %v366_v47  ;;  %v657_v0 = vpop.f32.mrb[3].mxu0 }
 0x2f2   :  { %691 = vmatmul.mubr.f32.vlgmr.msra.gmra.mrb[2].mxu1 %v367_v48 }
 0x3c5   :  { %v459_v50 = vpop.f32.mrb[2].mxu1 }
 0x3c6   :  { %v460_v51 = vadd.f32 %v484_v49, %v459_v50  ;;  %v692_v52 = vpop.f32.mrb[3].mxu1 }
 0x3c8   :  { %463 = vst [vmem:[#allocation10] sm:$0xff] %v460_v51 }
 0x3c9   :  { %898 = shalt.err (!%p895_p8)
}
 0x3ca   :  { %s899_s26 = scalar_lea.hbm %s1127_s9, 128 }
 0x3cb   :  { %p900_p9 = scmp.ne.s32.totalorder %s1127_s9, %s899_s26  ;;  %p903_p10 = scmp.lt.u32.totalorder %s899_s26, %s1127_s9 }
 0x3cd   :  { %p905_p11 = pnand %p903_p10, %p900_p9 }
 0x3cf   :  { %908 = shalt.err (!%p905_p11)
}
 0x3d0   :  { %473 = dma.vmem_to_hbm [thread:$0]  %s471_s23, 128, %s1127_s9, [#allocation4]  }
 0x3d1   :  { %915 = dma.done.wait [#allocation4], 128  }
 0x3d2   :  { %916 = vsyncadd [#allocation4], 4294967168 }
 0x3d3   :  { %477 = vsyncpa [#allocation3], 1 }
 0x3d4   :  { %478 = vsyncpa [#allocation6], 1 }
 0x3d5   :  { %479 = vsyncpa [#allocation9], 1 }
 0x3d6   :  { %480 = vsyncpa [#allocation4], 1 }

</bundles_post_ra>
